<compile_context>
chip_gen: v7x
topology: tpu7x:2x2x1
jax: 0.10.0
libtpu: 0.0.40
codegen_flags: <defaults>
</compile_context>

<pallas_src>
import functools

import jax
import jax.numpy as jnp
from jax.experimental import pallas as pl
from jax.experimental.pallas import tpu as pltpu


def _pick_block_rows(n_rows, n_cols, itemsize, *, max_rows, input_budget_bytes=24 << 20):
    """Largest row-tile (multiple of 8, <= max_rows) whose 2 double-buffered
    inputs fit the VMEM budget.  A block equal to the full row extent is always
    legal, so small problems get a single grid step."""
    per_row = 2 * 2 * max(n_cols, 1) * itemsize          # 2 inputs x double buffering
    fit = max(8, (input_budget_bytes // per_row) // 8 * 8)
    rows = min(max_rows, fit)
    if n_rows <= rows:
        return n_rows                                    # single / full-extent block
    return rows                                          # multiple of 8; last tile masked


def _write_two_partials(out_ref, a, b):
    """Write two scalar partial sums into lanes 0 / 1 of a (1,1,128) output block."""
    lane = jax.lax.broadcasted_iota(jnp.int32, (1, 1, 128), 2)
    out_ref[...] = jnp.where(lane == 0, a, jnp.where(lane == 1, b, 0.0))


# ---------------------------------------------------------------------------
# Kernel 1: weighted softmax cross-entropy (loss_labels)
# ---------------------------------------------------------------------------

def _weighted_ce_kernel(logits_ref, tgt_ref, out_ref, *,
                        num_classes, eos_coef, n_rows, block_rows):
    """Weighted softmax cross-entropy partial sums over a (tn, C1) tile.

    logits_ref: [tn, C1] logits (unpadded class axis)
    tgt_ref:    [tn, 1]  int32 target class
    out block:  [1, 1, 128]; lane0 = sum(w * nll), lane1 = sum(w)
    """
    i = pl.program_id(0)
    logits = logits_ref[...].astype(jnp.float32)                      # [tn, C1]
    tgt = tgt_ref[...]                                                # [tn, 1] int32
    tn = logits.shape[0]

    # Row validity for the (possibly partial) last tile; OOB rows hold garbage.
    row_ids = i * block_rows + jax.lax.broadcasted_iota(jnp.int32, (tn, 1), 0)
    row_valid = row_ids < n_rows

    # One-hot + class weight built in-kernel (no extra HBM traffic).
    class_ids = jax.lax.broadcasted_iota(jnp.int32, logits.shape, 1)
    onehot = (class_ids == tgt).astype(jnp.float32)                   # [tn, C1]
    w = jnp.where(tgt == num_classes, eos_coef, 1.0)
    w = jnp.where(row_valid, w, 0.0)

    m = jnp.max(logits, axis=-1, keepdims=True)
    lse = jnp.log(jnp.sum(jnp.exp(logits - m), axis=-1, keepdims=True)) + m
    tgt_logit = jnp.sum(onehot * logits, axis=-1, keepdims=True)
    nll = jnp.where(row_valid, lse - tgt_logit, 0.0)                  # select, not mul

    _write_two_partials(out_ref, jnp.sum(w * nll), jnp.sum(w))


def weighted_cross_entropy(logits2d, targets, num_classes, eos_coef, *, max_block_rows=2048):
    """F.cross_entropy(logits, targets, weight=[1,...,1,eos_coef]), mean reduction."""
    N, C1 = logits2d.shape
    itemsize = jnp.dtype(logits2d.dtype).itemsize
    tn = _pick_block_rows(N, C1, itemsize, max_rows=max_block_rows)
    grid = pl.cdiv(N, tn)

    targets2d = targets.reshape(N, 1).astype(jnp.int32)

    cost = pl.CostEstimate(
        flops=int(8 * N * C1),
        transcendentals=int(N * C1 + N),
        bytes_accessed=int(N * C1 * itemsize + N * 4 + grid * 128 * 4),
    )
    kernel = functools.partial(_weighted_ce_kernel,
                               num_classes=int(num_classes), eos_coef=float(eos_coef),
                               n_rows=int(N), block_rows=int(tn))
    partials = pl.pallas_call(
        kernel,
        out_shape=jax.ShapeDtypeStruct((grid, 1, 128), jnp.float32),
        grid_spec=pltpu.PrefetchScalarGridSpec(
            num_scalar_prefetch=0,
            grid=(grid,),
            in_specs=[pl.BlockSpec((tn, C1), lambda i: (i, 0)),
                      pl.BlockSpec((tn, 1), lambda i: (i, 0))],
            out_specs=pl.BlockSpec((1, 1, 128), lambda i: (i, 0, 0))),
        compiler_params=pltpu.CompilerParams(
            dimension_semantics=("parallel",),
            vmem_limit_bytes=32 * 1024 * 1024),
        cost_estimate=cost,
    )(logits2d, targets2d)

    loss_sum = jnp.sum(partials[:, 0, 0])
    w_sum = jnp.sum(partials[:, 0, 1])
    return loss_sum / w_sum


# ---------------------------------------------------------------------------
# Kernel 2: sigmoid BCE + DICE over point-sampled masks (loss_masks)
# ---------------------------------------------------------------------------

def _mask_loss_kernel(logits_ref, labels_ref, out_ref, *, n_rows, block_rows, n_points):
    """sigmoid_ce_loss + dice_loss partial sums over a (tm, P) tile.

    logits_ref / labels_ref: [tm, P] point-sampled mask logits / binary labels
    out block:               [1, 1, 128]; lane0 = sum(mean-BCE per mask), lane1 = sum(dice)
    """
    i = pl.program_id(0)
    x = logits_ref[...].astype(jnp.float32)                           # [tm, P]
    t = labels_ref[...].astype(jnp.float32)                           # [tm, P]
    tm = x.shape[0]

    row_ids = i * block_rows + jax.lax.broadcasted_iota(jnp.int32, (tm, 1), 0)
    row_valid = row_ids < n_rows

    # One exp per element, reused by BCE and the sigmoid.
    e = jnp.exp(-jnp.abs(x))
    bce = jnp.maximum(x, 0.0) - x * t + jnp.log(1.0 + e)              # stable BCE-with-logits
    ce_per_mask = jnp.sum(bce, axis=1, keepdims=True) * (1.0 / n_points)

    r = pl.reciprocal(1.0 + e, approx=True)
    p = jnp.where(x >= 0.0, r, e * r)                                 # sigmoid(x)
    num = 2.0 * jnp.sum(p * t, axis=1, keepdims=True)
    den = jnp.sum(p + t, axis=1, keepdims=True)                       # merged reduction
    dice = 1.0 - (num + 1.0) / (den + 1.0)

    ce_per_mask = jnp.where(row_valid, ce_per_mask, 0.0)
    dice = jnp.where(row_valid, dice, 0.0)

    _write_two_partials(out_ref, jnp.sum(ce_per_mask), jnp.sum(dice))


def mask_losses(point_logits, point_labels, num_masks, *, max_block_rows=512):
    """Returns (sigmoid_ce_loss, dice_loss) as in the PyTorch reference."""
    M, P = point_logits.shape
    itemsize = jnp.dtype(point_logits.dtype).itemsize
    tm = _pick_block_rows(M, P, itemsize, max_rows=max_block_rows)
    grid = pl.cdiv(M, tm)

    # TODO(synk): if num_points grows beyond ~100k, add a second grid axis over
    # the point dim with per-row partial-sum scratch so VMEM stays bounded.
    cost = pl.CostEstimate(
        flops=int(12 * M * P),
        transcendentals=int(3 * M * P),
        bytes_accessed=int(2 * M * P * itemsize + grid * 128 * 4),
    )
    kernel = functools.partial(_mask_loss_kernel,
                               n_rows=int(M), block_rows=int(tm), n_points=int(P))
    partials = pl.pallas_call(
        kernel,
        out_shape=jax.ShapeDtypeStruct((grid, 1, 128), jnp.float32),
        grid_spec=pltpu.PrefetchScalarGridSpec(
            num_scalar_prefetch=0,
            grid=(grid,),
            in_specs=[pl.BlockSpec((tm, P), lambda i: (i, 0)),
                      pl.BlockSpec((tm, P), lambda i: (i, 0))],
            out_specs=pl.BlockSpec((1, 1, 128), lambda i: (i, 0, 0))),
        compiler_params=pltpu.CompilerParams(
            dimension_semantics=("parallel",),
            vmem_limit_bytes=48 * 1024 * 1024),
        cost_estimate=cost,
    )(point_logits, point_labels)

    ce_sum = jnp.sum(partials[:, 0, 0])
    dice_sum = jnp.sum(partials[:, 0, 1])
    return ce_sum / num_masks, dice_sum / num_masks


# ---------------------------------------------------------------------------
# Plain-JAX glue (point sampling, uncertainty sampling, permutation indexing)
# ---------------------------------------------------------------------------

def point_sample(img, coords):
    """Bilinear sampling equivalent to detectron2 point_sample (align_corners=False).

    img: [M, H, W], coords: [M, P, 2] (x, y) in [0, 1]  ->  [M, P]
    """
    # TODO(synk): fuse this gather + the BCE/DICE kernel into one Pallas kernel
    # (HBM-resident masks + make_async_copy) if the profile shows it dominating.
    M, H, W = img.shape
    g = 2.0 * coords - 1.0
    x = ((g[..., 0] + 1.0) * W - 1.0) / 2.0
    y = ((g[..., 1] + 1.0) * H - 1.0) / 2.0
    x0 = jnp.floor(x)
    y0 = jnp.floor(y)
    x1 = x0 + 1.0
    y1 = y0 + 1.0
    wx1 = x - x0
    wx0 = 1.0 - wx1
    wy1 = y - y0
    wy0 = 1.0 - wy1

    flat = img.reshape(M, H * W)

    def gather(ix, iy):
        valid = (ix >= 0.0) & (ix <= W - 1.0) & (iy >= 0.0) & (iy <= H - 1.0)
        ixc = jnp.clip(ix, 0.0, W - 1.0).astype(jnp.int32)
        iyc = jnp.clip(iy, 0.0, H - 1.0).astype(jnp.int32)
        vals = jnp.take_along_axis(flat, iyc * W + ixc, axis=1)
        return jnp.where(valid, vals, 0.0)

    v00 = gather(x0, y0)
    v01 = gather(x1, y0)
    v10 = gather(x0, y1)
    v11 = gather(x1, y1)
    return v00 * wx0 * wy0 + v01 * wx1 * wy0 + v10 * wx0 * wy1 + v11 * wx1 * wy1


def get_uncertain_point_coords_with_randomness(key, coarse_logits, num_points,
                                               oversample_ratio, importance_sample_ratio):
    """JAX port of detectron2's point sampler; uncertainty = -|logit| (class-agnostic)."""
    R = coarse_logits.shape[0]
    num_sampled = int(num_points * oversample_ratio)
    k1, k2 = jax.random.split(key)
    point_coords = jax.random.uniform(k1, (R, num_sampled, 2), dtype=jnp.float32)
    point_logits = point_sample(coarse_logits, point_coords)
    point_uncertainties = -jnp.abs(point_logits)                      # calculate_uncertainty
    num_uncertain_points = int(importance_sample_ratio * num_points)
    num_random_points = num_points - num_uncertain_points
    _, idx = jax.lax.top_k(point_uncertainties, num_uncertain_points)
    picked = jnp.take_along_axis(
        point_coords, jnp.repeat(idx[..., None], 2, axis=-1), axis=1)
    if num_random_points > 0:
        rnd = jax.random.uniform(k2, (R, num_random_points, 2), dtype=jnp.float32)
        picked = jnp.concatenate([picked, rnd], axis=1)
    return picked


def simple_matcher(outputs, targets):
    # TODO(synk): Hungarian (linear_sum_assignment) matcher has no clean Pallas
    # equivalent; use deterministic identity matching (query i <-> target i).
    return [(jnp.arange(t['labels'].shape[0], dtype=jnp.int32),
             jnp.arange(t['labels'].shape[0], dtype=jnp.int32)) for t in targets]


class SetCriterionPallas:
    def __init__(self, num_classes, matcher, weight_dict, eos_coef, losses,
                 num_points, oversample_ratio, importance_sample_ratio, dn_no_lb=False):
        self.num_classes = num_classes
        self.matcher = matcher
        self.weight_dict = weight_dict
        self.eos_coef = eos_coef
        self.losses = losses
        self.dn_no_lb = dn_no_lb
        # buffer kept for parity with the PyTorch module (weighting is done in-kernel)
        self.empty_weight = jnp.ones((num_classes + 1,), jnp.float32).at[-1].set(eos_coef)
        self.num_points = num_points
        self.oversample_ratio = oversample_ratio
        self.importance_sample_ratio = importance_sample_ratio

    # --- permutation helpers -------------------------------------------------
    @staticmethod
    def _get_src_permutation_idx(indices):
        batch_idx = jnp.concatenate(
            [jnp.full_like(src, i) for i, (src, _) in enumerate(indices)])
        src_idx = jnp.concatenate([src for src, _ in indices])
        return batch_idx, src_idx

    @staticmethod
    def _get_tgt_permutation_idx(indices):
        batch_idx = jnp.concatenate(
            [jnp.full_like(tgt, i) for i, (_, tgt) in enumerate(indices)])
        tgt_idx = jnp.concatenate([tgt for _, tgt in indices])
        return batch_idx, tgt_idx

    # --- individual losses ----------------------------------------------------
    def loss_labels(self, outputs, targets, indices, num_masks):
        src_logits = outputs['pred_logits'].astype(jnp.float32)        # [B, Q, C+1]
        B, Q, C1 = src_logits.shape
        batch_idx, src_idx = self._get_src_permutation_idx(indices)
        target_classes_o = jnp.concatenate(
            [t['labels'][J] for t, (_, J) in zip(targets, indices)])
        target_classes = jnp.full((B, Q), self.num_classes, dtype=jnp.int32)
        target_classes = target_classes.at[batch_idx, src_idx].set(
            target_classes_o.astype(jnp.int32))
        loss_ce = weighted_cross_entropy(
            src_logits.reshape(-1, C1), target_classes.reshape(-1),
            self.num_classes, self.eos_coef)
        return {'loss_ce': loss_ce}

    def loss_masks(self, outputs, targets, indices, num_masks, key):
        batch_idx, src_idx = self._get_src_permutation_idx(indices)
        tgt_batch_idx, tgt_idx = self._get_tgt_permutation_idx(indices)

        pred_masks = outputs['pred_masks']                              # [B, Q, H, W]
        src_masks = pred_masks[batch_idx, src_idx]                      # [M, H, W]
        # TODO(synk): nested_tensor_from_tensor_list ragged padding not needed here
        # (targets are assumed equal-size per batch element); stack directly.
        target_masks_all = jnp.stack([t['masks'] for t in targets])     # [B, N, H, W]
        target_masks = target_masks_all[tgt_batch_idx, tgt_idx].astype(src_masks.dtype)

        # point selection and labels are computed under no_grad in the reference
        point_coords = jax.lax.stop_gradient(
            get_uncertain_point_coords_with_randomness(
                key, src_masks, self.num_points,
                self.oversample_ratio, self.importance_sample_ratio))
        point_labels = jax.lax.stop_gradient(point_sample(target_masks, point_coords))
        point_logits = point_sample(src_masks, point_coords)

        loss_mask, loss_dice = mask_losses(point_logits, point_labels, num_masks)
        return {'loss_mask': loss_mask, 'loss_dice': loss_dice}

    # --- forward ---------------------------------------------------------------
    def forward(self, outputs, targets, key):
        outputs_without_aux = {k: v for k, v in outputs.items()
                               if k != 'aux_outputs' and k != 'dn_out'}
        losses = {}
        num_masks = sum(int(t['labels'].shape[0]) for t in targets)
        num_masks = max(float(num_masks), 1.0)     # single-device: world_size == 1

        indices = self.matcher(outputs_without_aux, targets)
        for loss in self.losses:
            if loss == 'labels':
                losses.update(self.loss_labels(outputs, targets, indices, num_masks))
            elif loss == 'masks':
                losses.update(self.loss_masks(outputs, targets, indices, num_masks, key))

        # TODO(synk): denoising (dn_out) training branch and aux_outputs loop not
        # implemented; this reproduces the eval / no-dn path (zero dn losses).
        losses['loss_mask_dn'] = jnp.asarray(0.0, jnp.float32)
        losses['loss_dice_dn'] = jnp.asarray(0.0, jnp.float32)
        losses['loss_ce_dn'] = jnp.asarray(0.0, jnp.float32)

        if self.dn_no_lb:
            losses = {k: v for k, v in losses.items() if not k.startswith('loss_ce_dn')}
        return losses


# ---------------------------------------------------------------------------
if __name__ == "__main__":
    key = jax.random.PRNGKey(0)
    B, Q, C, H, W, N = 2, 8, 3, 16, 16, 3      # batch, queries, classes, spatial, targets/img
    num_points = 16

    k1, k2, k3, k4, kpts = jax.random.split(key, 5)
    pred_logits = jax.random.normal(k1, (B, Q, C + 1), dtype=jnp.float32)
    pred_masks = jax.random.normal(k2, (B, Q, H, W), dtype=jnp.float32)
    labels = jax.random.randint(k3, (B, N), 0, C, dtype=jnp.int32)
    masks = (jax.random.normal(k4, (B, N, H, W)) > 0.0).astype(jnp.float32)

    targets = [{'labels': labels[i], 'masks': masks[i]} for i in range(B)]
    outputs = {'pred_logits': pred_logits, 'pred_masks': pred_masks, 'dn_out': None}

    criterion = SetCriterionPallas(
        num_classes=C,
        matcher=simple_matcher,
        weight_dict={'loss_ce': 1.0, 'loss_mask': 5.0, 'loss_dice': 5.0},
        eos_coef=0.1,
        losses=['labels', 'masks'],
        num_points=num_points,
        oversample_ratio=3.0,
        importance_sample_ratio=0.75,
    )

    # --- numerical self-check of both kernels (f32 end-to-end; only the dice
    #     sigmoid uses the ~2^-12 approx reciprocal) ---
    def _close(a, b, rtol=2e-3, atol=1e-4):
        a = float(a)
        b = float(b)
        return abs(a - b) <= atol + rtol * abs(b)

    kc = jax.random.split(jax.random.PRNGKey(1), 4)
    chk_logits = jax.random.normal(kc[0], (10, C + 1), dtype=jnp.float32)
    chk_tgt = jax.random.randint(kc[1], (10,), 0, C + 1, dtype=jnp.int32)
    got_ce = weighted_cross_entropy(chk_logits, chk_tgt, C, 0.1)
    wref = jnp.where(chk_tgt == C, 0.1, 1.0)
    nll = (jax.nn.logsumexp(chk_logits, axis=-1)
           - jnp.take_along_axis(chk_logits, chk_tgt[:, None], axis=1)[:, 0])
    want_ce = jnp.sum(wref * nll) / jnp.sum(wref)
    assert _close(got_ce, want_ce), (float(got_ce), float(want_ce))

    chk_x = jax.random.normal(kc[2], (6, num_points), dtype=jnp.float32)
    chk_t = (jax.random.normal(kc[3], (6, num_points)) > 0.0).astype(jnp.float32)
    got_m, got_d = mask_losses(chk_x, chk_t, 3.0)
    bce_ref = (jnp.maximum(chk_x, 0.0) - chk_x * chk_t
               + jnp.log1p(jnp.exp(-jnp.abs(chk_x))))
    want_m = jnp.sum(jnp.mean(bce_ref, axis=1)) / 3.0
    pr = jax.nn.sigmoid(chk_x)
    want_d = jnp.sum(1.0 - (2.0 * jnp.sum(pr * chk_t, axis=1) + 1.0)
                     / (jnp.sum(pr, axis=1) + jnp.sum(chk_t, axis=1) + 1.0)) / 3.0
    assert _close(got_m, want_m), (float(got_m), float(want_m))
    assert _close(got_d, want_d), (float(got_d), float(want_d))

    # --- full criterion forward ---
    losses = criterion.forward(outputs, targets, kpts)
    losses = jax.block_until_ready(losses)
    assert all(bool(jnp.isfinite(v)) for v in losses.values())
    print("KERNEL_OK")
</pallas_src>

<mosaic_0001>
module attributes {stable_mosaic.version = 11 : i64} {
  func.func @_weighted_ce_kernel(%arg0: i32, %arg1: memref<10x4xf32, #tpu.memory_space<vmem>>, %arg2: memref<10x1xi32, #tpu.memory_space<vmem>>, %arg3: memref<1x1x128xf32, #tpu.memory_space<vmem>>) attributes {dimension_semantics = [#tpu.dimension_semantics<parallel>], iteration_bounds = array<i64: 1>, scalar_prefetch = 0 : i64, scratch_operands = 0 : i64, tpu.core_type = #tpu.core_type<tc>, window_params = [{transform_indices = @transform_0, window_bounds = array<i64: 10, 4>}, {transform_indices = @transform_1, window_bounds = array<i64: 10, 1>}, {transform_indices = @transform_2, window_bounds = array<i64: 1, 1, 128>}]} {
    %c0 = arith.constant 0 : index
    %c0_0 = arith.constant 0 : index
    %0 = vector.load %arg1[%c0, %c0_0] : memref<10x4xf32, #tpu.memory_space<vmem>>, vector<10x4xf32>
    %c0_1 = arith.constant 0 : index
    %c0_2 = arith.constant 0 : index
    %1 = vector.load %arg2[%c0_1, %c0_2] : memref<10x1xi32, #tpu.memory_space<vmem>>, vector<10x1xi32>
    %c10_i32 = arith.constant 10 : i32
    %2 = arith.muli %arg0, %c10_i32 : i32
    %3 = tpu.iota {dimensions = array<i32: 0>} : vector<10x1xi32>
    %4 = vector.broadcast %2 : i32 to vector<10x1xi32>
    %5 = arith.addi %4, %3 : vector<10x1xi32>
    %c10_i32_3 = arith.constant 10 : i32
    %6 = vector.broadcast %c10_i32_3 : i32 to vector<10x1xi32>
    %7 = arith.cmpi slt, %5, %6 : vector<10x1xi32>
    %8 = tpu.iota {dimensions = array<i32: 1>} : vector<10x4xi32>
    %9 = vector.broadcast %1 : vector<10x1xi32> to vector<10x4xi32>
    %10 = arith.cmpi eq, %8, %9 : vector<10x4xi32>
    %11 = arith.extui %10 : vector<10x4xi1> to vector<10x4xi32>
    %12 = arith.sitofp %11 : vector<10x4xi32> to vector<10x4xf32>
    %c3_i32 = arith.constant 3 : i32
    %13 = vector.broadcast %c3_i32 : i32 to vector<10x1xi32>
    %14 = arith.cmpi eq, %1, %13 : vector<10x1xi32>
    %cst = arith.constant 1.000000e-01 : f32
    %cst_4 = arith.constant 1.000000e+00 : f32
    %15 = vector.broadcast %cst : f32 to vector<10x1xf32>
    %16 = vector.broadcast %cst_4 : f32 to vector<10x1xf32>
    %17 = arith.select %14, %15, %16 : vector<10x1xi1>, vector<10x1xf32>
    %cst_5 = arith.constant 0.000000e+00 : f32
    %18 = vector.broadcast %cst_5 : f32 to vector<10x1xf32>
    %19 = arith.select %7, %17, %18 : vector<10x1xi1>, vector<10x1xf32>
    %cst_6 = arith.constant dense<0xFF800000> : vector<10xf32>
    %20 = vector.multi_reduction <maximumf>, %0, %cst_6 [1] : vector<10x4xf32> to vector<10xf32>
    %21 = vector.shape_cast %20 : vector<10xf32> to vector<10x1xf32>
    %22 = vector.broadcast %21 : vector<10x1xf32> to vector<10x4xf32>
    %23 = arith.subf %0, %22 : vector<10x4xf32>
    %24 = math.exp %23 : vector<10x4xf32>
    %cst_7 = arith.constant dense<0.000000e+00> : vector<10xf32>
    %25 = vector.multi_reduction <add>, %24, %cst_7 [1] : vector<10x4xf32> to vector<10xf32>
    %26 = vector.shape_cast %25 : vector<10xf32> to vector<10x1xf32>
    %27 = math.log %26 : vector<10x1xf32>
    %28 = arith.addf %27, %21 : vector<10x1xf32>
    %29 = arith.mulf %12, %0 : vector<10x4xf32>
    %cst_8 = arith.constant dense<0.000000e+00> : vector<10xf32>
    %30 = vector.multi_reduction <add>, %29, %cst_8 [1] : vector<10x4xf32> to vector<10xf32>
    %31 = vector.shape_cast %30 : vector<10xf32> to vector<10x1xf32>
    %32 = arith.subf %28, %31 : vector<10x1xf32>
    %cst_9 = arith.constant 0.000000e+00 : f32
    %33 = vector.broadcast %cst_9 : f32 to vector<10x1xf32>
    %34 = arith.select %7, %32, %33 : vector<10x1xi1>, vector<10x1xf32>
    %35 = arith.mulf %19, %34 : vector<10x1xf32>
    %36 = vector.shape_cast %35 : vector<10x1xf32> to vector<1x10x1xf32>
    %cst_10 = arith.constant dense<0.000000e+00> : vector<1xf32>
    %37 = vector.multi_reduction <add>, %36, %cst_10 [1, 2] : vector<1x10x1xf32> to vector<1xf32>
    %38 = vector.shape_cast %37 : vector<1xf32> to vector<1x1x1xf32>
    %39 = vector.extract %38[0, 0, 0] : f32 from vector<1x1x1xf32>
    %40 = vector.shape_cast %19 : vector<10x1xf32> to vector<1x10x1xf32>
    %cst_11 = arith.constant dense<0.000000e+00> : vector<1xf32>
    %41 = vector.multi_reduction <add>, %40, %cst_11 [1, 2] : vector<1x10x1xf32> to vector<1xf32>
    %42 = vector.shape_cast %41 : vector<1xf32> to vector<1x1x1xf32>
    %43 = vector.extract %42[0, 0, 0] : f32 from vector<1x1x1xf32>
    %44 = tpu.iota {dimensions = array<i32: 2>} : vector<1x1x128xi32>
    %c0_i32 = arith.constant 0 : i32
    %45 = vector.broadcast %c0_i32 : i32 to vector<1x1x128xi32>
    %46 = arith.cmpi eq, %44, %45 : vector<1x1x128xi32>
    %c1_i32 = arith.constant 1 : i32
    %47 = vector.broadcast %c1_i32 : i32 to vector<1x1x128xi32>
    %48 = arith.cmpi eq, %44, %47 : vector<1x1x128xi32>
    %cst_12 = arith.constant 0.000000e+00 : f32
    %49 = vector.broadcast %43 : f32 to vector<1x1x128xf32>
    %50 = vector.broadcast %cst_12 : f32 to vector<1x1x128xf32>
    %51 = arith.select %48, %49, %50 : vector<1x1x128xi1>, vector<1x1x128xf32>
    %52 = vector.broadcast %39 : f32 to vector<1x1x128xf32>
    %53 = arith.select %46, %52, %51 : vector<1x1x128xi1>, vector<1x1x128xf32>
    %c0_13 = arith.constant 0 : index
    %c0_14 = arith.constant 0 : index
    %c0_15 = arith.constant 0 : index
    %54 = vector.load %arg3[%c0_13, %c0_14, %c0_15] : memref<1x1x128xf32, #tpu.memory_space<vmem>>, vector<1x1x128xf32>
    tpu.vector_store %arg3[%c0_13, %c0_14, %c0_15], %53 {strides = array<i32>} : memref<1x1x128xf32, #tpu.memory_space<vmem>>, vector<1x1x128xf32>,
    return
  }
  func.func @transform_0(%arg0: i32) -> (i32, i32) {
    %c0_i32 = arith.constant 0 : i32
    %c0_i32_0 = arith.constant 0 : i32
    return %arg0, %c0_i32 : i32, i32
  }
  func.func @transform_1(%arg0: i32) -> (i32, i32) {
    %c0_i32 = arith.constant 0 : i32
    %c0_i32_0 = arith.constant 0 : i32
    return %arg0, %c0_i32 : i32, i32
  }
  func.func @transform_2(%arg0: i32) -> (i32, i32, i32) {
    %c0_i32 = arith.constant 0 : i32
    %c0_i32_0 = arith.constant 0 : i32
    %c0_i32_1 = arith.constant 0 : i32
    return %arg0, %c0_i32, %c0_i32_0 : i32, i32, i32
  }
}

</mosaic_0001>

<bundles_post_ra>
// kernel: tpu_custom_call.1
= control target key start
LH: loop header
LB: loop body
LE: loop exit
PB: predicated region body
PF: predicated region fallthrough
CT: control target
= control target key end

     0   :  { %vm49_vm0 = vcmask 25600   ;;  %vm45_vm1 = vcmask 31744   ;;  %v17_v2 = vlaneseq  ;;  %v176_v4 = vmov 0   ;;  %s237_s0 = inlined_call_operand.vmem [shape: f32[10,4], index: 0, kind: input, shape index: {}]   ;;  %s238_s1 = inlined_call_operand.vmem [shape: s32[10,1], index: 1, kind: input, shape index: {}]   ;;  %s239_s2 = inlined_call_operand.hbm [shape: f32[1,1,128], index: 2, kind: output, shape index: {}]  }
   0x1   :  { %v13_v0 = vld [vmem:[%s237_s0 + $0x8] sm:$0x3]  ;;  %v12_v1 = vld [vmem:[%s237_s0] sm:$0xff]  ;;  %142 = vset.pattern.permute.xlu1 %v176_v4  ;;  %143 = vset.pattern.permute.xlu0 %v176_v4 }
   0x2   :  { %v50_v3 = vsel %vm49_vm0, %v13_v0, -inf  ;;  %v15_v5 = vld [vmem:[%s238_s1 + $0x8] sm:$0x3]  ;;  %v18_v6 = vshrl.u32 %v17_v2, 7 }
   0x3   :  { %51 = vmax.xlane.f32.xlu0 %v50_v3  ;;  %31 = vperm.xlu1 %142, %v15_v5   ;;  %vm40_vm2 = vcmp.eq.s32.totalorder %v15_v5, 3 }
   0x4   :  { %7 = vsyncpa [#allocation3], 0  ;;  %v46_v7 = vsel %vm45_vm1, %v12_v1, -inf  ;;  %v14_v8 = vld [vmem:[%s238_s1] sm:$0xff]  ;;  %v19_v9 = vadd.s32 8, %v18_v6  ;;  %v177_v10 = vmov 1.0  }
   0x5   :  { %v42_v11 = vsel %vm40_vm2, 0.1, %v177_v10  ;;  %v210_v18 = vand.u32 127, %v17_v2  ;;  %v178_v22 = vmov 0.0   ;;  %vm39_vm6 = vcmp.eq.s32.totalorder %v14_v8, 3  ;;  %s179_s16 = smov [#allocation2]  }
   0x6   :  { %vm24_vm3 = vcmp.lt.s32.totalorder %v19_v9, 10  ;;  %v41_v33 = vsel %vm39_vm6, 0.1, %v177_v10  ;;  %vm85_vm7 = vcmask 7168   ;;  %vm87_vm8 = vcmask 1024   ;;  %s124_s17 = sshll.u32 %s179_s16, 4  ;;  %s125_s17 = int_to_ptr.vmem [resolvable:$true] %s124_s17 }
   0x7   :  { %47 = vmax.xlane.f32.xlu0 %v46_v7  ;;  %28 = vperm.xlu1 %142, %v14_v8   ;;  %v44_v12 = vsel %vm24_vm3, %v42_v11, 0.0  ;;  %v99_v34 = vsel %vm85_vm7, %v41_v33, 0.0  ;;  %vm112_vm9 = vcmp.eq.s32.totalorder %v210_v18, 1  ;;  %vm111_vm10 = vcmp.eq.s32.totalorder %v210_v18, 0  ;;  %s152_s19 = scalar_lea.vmem %s125_s17, 16  ;;  %s156_s20 = scalar_lea.vmem %s125_s17, 32 }
   0x8   :  { %v100_v35 = vsel %vm87_vm8, %v44_v12, 0.0  ;;  %p153_p0 = scmp.ne.s32.totalorder %s125_s17, %s152_s19  ;;  %p157_p1 = scmp.lt.s32.totalorder %s125_s17, %s125_s17 }
   0x9   :  { %v101_v36 = vadd.f32 %v100_v35, %v99_v34  ;;  %p158_p2 = scmp.lt.s32.totalorder %s156_s20, %s152_s19 }
   0xb   :  { %p159_p3 = por %p158_p2, %p157_p1 }
   0xd   :  { %p160_p4 = pnand %p159_p3, %p153_p0 }
  0x82   :  { %v32_v16 = vpop.permute.xlu1 %31 }
  0x83   :  { %vm34_vm4 = vcmp.eq.s32.totalorder %v210_v18, %v32_v16 }
  0x84   :  { %v133_v23 = vsel %vm34_vm4, 1.0, %v178_v22 }
  0x85   :  { %v72_v24 = vmul.f32 %v133_v23, %v13_v0 }
  0x86   :  { %v29_v21 = vpop.permute.xlu1 %28 }
  0x87   :  { %vm33_vm5 = vcmp.eq.s32.totalorder %v210_v18, %v29_v21  ;;  %v76_v28 = vsel %vm49_vm0, %v72_v24, 0.0 }
  0x88   :  { %v132_v26 = vsel %vm33_vm5, 1.0, %v178_v22 }
  0x89   :  { %v71_v29 = vmul.f32 %v132_v26, %v12_v1 }
  0x8b   :  { %v73_v32 = vsel %vm45_vm1, %v71_v29, 0.0 }
  0x90   :  { %v52_v13 = vpop.xlane.xlu0 %51 }
  0x91   :  { %v54_v14 = vsub.f32 %v13_v0, %v52_v13 }
  0x93   :  { %v57_v15 = vmul.f32 1.442695, %v54_v14 }
  0x94   :  { %v48_v17 = vpop.xlane.xlu0 %47 }
  0x95   :  { %144 = vpow2.f32 %v57_v15  ;;  %v53_v19 = vsub.f32 %v12_v1, %v48_v17 }
  0x97   :  { %v55_v20 = vmul.f32 1.442695, %v53_v19 }
  0x99   :  { %146 = vpow2.f32 %v55_v20 }
  0x9f   :  { %v145_v25 = vpop.eup %144 }
  0xa0   :  { %v62_v27 = vsel %vm49_vm0, %v145_v25, 0.0 }
  0xa1   :  { %63 = vadd.xlane.f32.xlu0 %v62_v27 }
  0xa3   :  { %v147_v30 = vpop.eup %146 }
  0xa4   :  { %v59_v31 = vsel %vm45_vm1, %v147_v30, 0.0 }
  0xa5   :  { %60 = vadd.xlane.f32.xlu1 %v59_v31  ;;  %77 = vadd.xlane.f32.xlu0 %v76_v28 }
  0xa9   :  { %74 = vadd.xlane.f32.xlu0 %v73_v32 }
 0x12e   :  { %v64_v37 = vpop.xlane.xlu0 %63 }
 0x12f   :  { %148 = vlog2.f32 %v64_v37 }
 0x132   :  { %v61_v38 = vpop.xlane.xlu1 %60  ;;  %v78_v41 = vpop.xlane.xlu0 %77 }
 0x133   :  { %150 = vlog2.f32 %v61_v38 }
 0x136   :  { %v75_v49 = vpop.xlane.xlu0 %74 }
 0x139   :  { %v149_v39 = vpop.eup %148 }
 0x13a   :  { %v68_v40 = vmul.f32 0.6931472, %v149_v39 }
 0x13c   :  { %v70_v42 = vadd.f32 %v68_v40, %v52_v13 }
 0x13d   :  { %v151_v43 = vpop.eup %150 }
 0x13e   :  { %v66_v44 = vmul.f32 0.6931472, %v151_v43  ;;  %v80_v45 = vsub.f32 %v70_v42, %v78_v41 }
 0x140   :  { %v82_v46 = vsel %vm24_vm3, %v80_v45, 0.0  ;;  %v69_v47 = vadd.f32 %v66_v44, %v48_v17 }
 0x141   :  { %v84_v48 = vmul.f32 %v82_v46, %v44_v12 }
 0x142   :  { %v79_v50 = vsub.f32 %v69_v47, %v75_v49 }
 0x143   :  { %v88_v53 = vsel %vm87_vm8, %v84_v48, 0.0 }
 0x144   :  { %v83_v51 = vmul.f32 %v79_v50, %v41_v33 }
 0x146   :  { %v86_v52 = vsel %vm85_vm7, %v83_v51, 0.0 }
 0x147   :  { %v89_v54 = vadd.f32 %v88_v53, %v86_v52 }
 0x149   :  { %90 = vadd.xlane.f32.xlu0 %v89_v54 }
 0x14d   :  { %102 = vadd.xlane.f32.xlu0 %v101_v36 }
 0x1d6   :  { %v91_v55 = vpop.xlane.xlu0 %90 }
 0x1d7   :  { %v92_v56 = vrot.slane %v91_v55, 4 }
 0x1d9   :  { %v93_v57 = vadd.f32 %v92_v56, %v91_v55 }
 0x1da   :  { %v103_v58 = vpop.xlane.xlu0 %102 }
 0x1db   :  { %v94_v59 = vrot.slane %v93_v57, 2  ;;  %v104_v60 = vrot.slane %v103_v58, 4 }
 0x1dd   :  { %v105_v61 = vadd.f32 %v104_v60, %v103_v58  ;;  %v95_v62 = vadd.f32 %v94_v59, %v93_v57 }
 0x1df   :  { %v106_v63 = vrot.slane %v105_v61, 2  ;;  %v96_v0 = vrot.slane %v95_v62, 1 }
 0x1e1   :  { %v107_v1 = vadd.f32 %v106_v63, %v105_v61  ;;  %v97_v2 = vadd.f32 %v96_v0, %v95_v62 }
 0x1e3   :  { %134 = vpush %v97_v2  ;;  %v108_v3 = vrot.slane %v107_v1, 1 }
 0x1e5   :  { %v109_v4 = vadd.f32 %v108_v3, %v107_v1 }
 0x1e7   :  { %136 = vpush %v109_v4 }
 0x214   :  { %s135_s1 = spop %134 }
 0x215   :  { %v115_v6 = vstv %s135_s1 }
 0x218   :  { %s137_s18 = spop %136 }
 0x219   :  { %v113_v5 = vstv %s137_s18 }
 0x21a   :  { %v114_v7 = vsel %vm112_vm9, %v113_v5, 0.0 }
 0x21b   :  { %v116_v8 = vsel %vm111_vm10, %v115_v6, %v114_v7 }
 0x21c   :  { %117 = vst [vmem:[#allocation2] sm:$0x1] %v116_v8 }
 0x21d   :  { %163 = shalt.err (!%p160_p4)
}
 0x21e   :  { %s164_s23 = scalar_lea.hbm %s239_s2, 16 }
 0x21f   :  { %p165_p5 = scmp.ne.s32.totalorder %s239_s2, %s164_s23  ;;  %p168_p6 = scmp.lt.u32.totalorder %s164_s23, %s239_s2 }
 0x221   :  { %p170_p7 = pnand %p168_p6, %p165_p5 }
 0x223   :  { %173 = shalt.err (!%p170_p7)
}
 0x224   :  { %127 = dma.vmem_to_hbm [thread:$0]  %s125_s17, 16, %s239_s2, [#allocation3]  }
 0x225   :  { %174 = dma.done.wait [#allocation3], 16  }
 0x226   :  { %175 = vsyncadd [#allocation3], 4294967280 }
 0x227   :  { %131 = vsyncpa [#allocation3], 1 }

</bundles_post_ra>
